<compile_context>
chip_gen: v6e
topology: v6e:2x2x1
jax: 0.10.0
libtpu: 0.0.40
codegen_flags: <defaults>
</compile_context>

<pallas_src>
import jax
import jax.numpy as jnp
from jax.experimental import pallas as pl
from jax.experimental.pallas import tpu as pltpu


# ---------------------------------------------------------------------------
# Kernel bodies
# ---------------------------------------------------------------------------
def _bce_core(p, y, m, w):
    """Elementwise BCE (f32 accumulate) * mask [* weights]. Works in/out of kernel."""
    p = p.astype(jnp.float32)
    y = y.astype(jnp.float32)
    m = m.astype(jnp.float32)
    neg_hundred = jnp.float32(-100.0)
    # PyTorch BCELoss clamps log outputs at -100 so p == 0 or p == 1 is finite.
    log_p = jnp.maximum(jnp.log(p), neg_hundred)
    log_1mp = jnp.maximum(jnp.log1p(-p), neg_hundred)
    loss = -(y * log_p + (1.0 - y) * log_1mp)
    out = loss * m
    if w is not None:
        out = out * w.astype(jnp.float32)
    return out


def _bce_kernel(pred_ref, lab_ref, mask_ref, out_ref):
    out_ref[...] = _bce_core(
        pred_ref[...], lab_ref[...], mask_ref[...], None).astype(out_ref.dtype)


def _bce_kernel_weighted(pred_ref, lab_ref, mask_ref, w_ref, out_ref):
    out_ref[...] = _bce_core(
        pred_ref[...], lab_ref[...], mask_ref[...], w_ref[...]).astype(out_ref.dtype)


# ---------------------------------------------------------------------------
# Wrapper
# ---------------------------------------------------------------------------
def _round_up(x, m):
    return ((x + m - 1) // m) * m


def _sublane_packing(dtype):
    # f32/i32 -> 8 sublanes, bf16/f16 -> 16, int8/bool(byte) -> 32.
    return 32 // jnp.dtype(dtype).itemsize


def _as_kernel_dtype(x):
    # bool VMEM tiles are awkward on TPU; promote bools once in the wrapper.
    if x is not None and x.dtype == jnp.bool_:
        return x.astype(jnp.float32)
    return x


def bxent_loss(predictions, labels, mask, weights=None, *,
               lanes=512, max_rows_per_block=512):
    """Pallas equivalent of BXentLoss.forward.

    predictions: probabilities in [0, 1], any shape
    labels:      same number of elements (binary), any dtype
    mask:        same number of elements
    weights:     optional, same number of elements
    returns:     (N,) masked per-element BCE loss, N = predictions.size,
                 dtype = predictions.dtype
    """
    out_dtype = predictions.dtype

    # Free reshapes of contiguous arrays; NO dtype casts here (done in-kernel).
    p = _as_kernel_dtype(predictions).reshape(-1)
    y = _as_kernel_dtype(labels).reshape(-1)
    m = _as_kernel_dtype(mask).reshape(-1)
    w = _as_kernel_dtype(weights).reshape(-1) if weights is not None else None

    N = p.shape[0]

    # Prefer a lane count (multiple of 128) that divides N exactly so the
    # whole array goes through the kernel with zero padding / tail handling.
    for cand in (lanes, 256, 128):
        if cand <= N and N % cand == 0:
            lanes = cand
            break

    rows = N // lanes
    bulk = rows * lanes
    tail = N - bulk

    streams = [p, y, m] + ([w] if w is not None else [])
    align = max([_sublane_packing(s.dtype) for s in streams]
                + [_sublane_packing(out_dtype)])

    outs = []
    if rows > 0:
        if rows <= align:
            tm = rows                                   # single full-extent block
        else:
            # >=2 blocks when possible (v7x megacore), capped so double-buffered
            # streams fit v5e's 16 MiB default scoped VMEM.
            tm = min(max_rows_per_block, _round_up(pl.cdiv(rows, 2), align))
        grid = (pl.cdiv(rows, tm),)                     # partial last block is fine

        in_arrays = [s[:bulk].reshape(rows, lanes) for s in streams]
        spec = pl.BlockSpec((tm, lanes), lambda i: (i, 0))
        kernel = _bce_kernel_weighted if w is not None else _bce_kernel

        bulk_out = pl.pallas_call(
            kernel,
            out_shape=jax.ShapeDtypeStruct((rows, lanes), out_dtype),
            grid=grid,
            in_specs=[spec] * len(in_arrays),
            out_specs=spec,
            compiler_params=pltpu.CompilerParams(
                dimension_semantics=("parallel",)),
        )(*in_arrays)
        outs.append(bulk_out.reshape(-1))

    if tail > 0:
        # < lanes leftover elements: not worth a kernel launch; plain jnp.
        tail_out = _bce_core(
            p[bulk:], y[bulk:], m[bulk:],
            w[bulk:] if w is not None else None).astype(out_dtype)
        outs.append(tail_out)

    if len(outs) == 1:
        return outs[0]
    return jnp.concatenate(outs)


# ---------------------------------------------------------------------------
# Pure-JAX reference mirroring torch.nn.BCELoss(reduction='none')
# ---------------------------------------------------------------------------
def _reference(predictions, labels, mask, weights=None):
    p = predictions.reshape(-1).astype(jnp.float32)
    y = labels.reshape(-1).astype(jnp.float32)
    m = mask.reshape(-1).astype(jnp.float32)
    log_p = jnp.maximum(jnp.log(p), -100.0)
    log_1mp = jnp.maximum(jnp.log1p(-p), -100.0)
    loss = -(y * log_p + (1.0 - y) * log_1mp)
    out = loss * m
    if weights is not None:
        out = out * weights.reshape(-1).astype(jnp.float32)
    return out


if __name__ == "__main__":
    key = jax.random.PRNGKey(0)

    # --- main demo: small shapes, N = 512 (exactly one lane-dense row) -----
    B, T, D = 2, 8, 32
    k1, k2, k3, k4 = jax.random.split(key, 4)
    predictions = jax.nn.sigmoid(
        jax.random.normal(k1, (B, T, D), dtype=jnp.float32))     # probs in (0,1)
    labels = jax.random.bernoulli(k2, 0.5, (B, T, D)).astype(jnp.float32)
    mask = (jax.random.uniform(k3, (B, T, D)) > 0.3).astype(jnp.float32)
    weights = jax.random.uniform(k4, (B, T, D), dtype=jnp.float32)

    out_w = jax.block_until_ready(bxent_loss(predictions, labels, mask, weights))
    ref_w = _reference(predictions, labels, mask, weights)
    assert out_w.shape == (B * T * D,)
    assert jnp.allclose(out_w, ref_w, atol=1e-5, rtol=1e-5), "mismatch (with weights)"

    out_nw = jax.block_until_ready(bxent_loss(predictions, labels, mask, None))
    ref_nw = _reference(predictions, labels, mask, None)
    assert jnp.allclose(out_nw, ref_nw, atol=1e-5, rtol=1e-5), "mismatch (no weights)"

    # --- N not a multiple of lanes: exercises bulk kernel + jnp tail path ---
    N2 = 3 * 512 + 100
    kk = jax.random.split(key, 4)
    p2 = jax.nn.sigmoid(jax.random.normal(kk[0], (N2,), dtype=jnp.float32))
    y2 = jax.random.bernoulli(kk[1], 0.5, (N2,)).astype(jnp.float32)
    m2 = (jax.random.uniform(kk[2], (N2,)) > 0.3).astype(jnp.float32)
    out2 = jax.block_until_ready(bxent_loss(p2, y2, m2))
    ref2 = _reference(p2, y2, m2)
    assert out2.shape == (N2,)
    assert jnp.allclose(out2, ref2, atol=1e-5, rtol=1e-5), "mismatch (tail path)"

    # --- bf16 predictions: narrow-dtype DMA, in-kernel upcast, bf16 output --
    B3, T3, D3 = 8, 32, 64                                 # N = 16384 -> 2 blocks
    k5, k6, k7 = jax.random.split(jax.random.PRNGKey(1), 3)
    p3 = jax.nn.sigmoid(
        jax.random.normal(k5, (B3, T3, D3), dtype=jnp.float32)).astype(jnp.bfloat16)
    y3 = jax.random.bernoulli(k6, 0.5, (B3, T3, D3)).astype(jnp.float32)
    m3 = (jax.random.uniform(k7, (B3, T3, D3)) > 0.3).astype(jnp.float32)
    out3 = jax.block_until_ready(bxent_loss(p3, y3, m3))
    ref3 = _reference(p3, y3, m3)
    assert out3.dtype == jnp.bfloat16
    assert jnp.allclose(out3.astype(jnp.float32), ref3, atol=2e-2, rtol=2e-2), \
        "mismatch (bf16 path)"

    print("KERNEL_OK")
</pallas_src>

<mosaic_0001>
module attributes {stable_mosaic.version = 11 : i64} {
  func.func @_bce_kernel_weighted(%arg0: i32, %arg1: memref<1x512xf32, #tpu.memory_space<vmem>>, %arg2: memref<1x512xf32, #tpu.memory_space<vmem>>, %arg3: memref<1x512xf32, #tpu.memory_space<vmem>>, %arg4: memref<1x512xf32, #tpu.memory_space<vmem>>, %arg5: memref<1x512xf32, #tpu.memory_space<vmem>>) attributes {dimension_semantics = [#tpu.dimension_semantics<parallel>], iteration_bounds = array<i64: 1>, scalar_prefetch = 0 : i64, scratch_operands = 0 : i64, tpu.core_type = #tpu.core_type<tc>, window_params = [{transform_indices = @transform_0, window_bounds = array<i64: 1, 512>}, {transform_indices = @transform_1, window_bounds = array<i64: 1, 512>}, {transform_indices = @transform_2, window_bounds = array<i64: 1, 512>}, {transform_indices = @transform_3, window_bounds = array<i64: 1, 512>}, {transform_indices = @transform_4, window_bounds = array<i64: 1, 512>}]} {
    %c0 = arith.constant 0 : index
    %c0_0 = arith.constant 0 : index
    %0 = vector.load %arg1[%c0, %c0_0] : memref<1x512xf32, #tpu.memory_space<vmem>>, vector<1x512xf32>
    %c0_1 = arith.constant 0 : index
    %c0_2 = arith.constant 0 : index
    %1 = vector.load %arg2[%c0_1, %c0_2] : memref<1x512xf32, #tpu.memory_space<vmem>>, vector<1x512xf32>
    %c0_3 = arith.constant 0 : index
    %c0_4 = arith.constant 0 : index
    %2 = vector.load %arg3[%c0_3, %c0_4] : memref<1x512xf32, #tpu.memory_space<vmem>>, vector<1x512xf32>
    %c0_5 = arith.constant 0 : index
    %c0_6 = arith.constant 0 : index
    %3 = vector.load %arg4[%c0_5, %c0_6] : memref<1x512xf32, #tpu.memory_space<vmem>>, vector<1x512xf32>
    %4 = math.log %0 : vector<1x512xf32>
    %cst = arith.constant -1.000000e+02 : f32
    %5 = vector.broadcast %cst : f32 to vector<1x512xf32>
    %6 = arith.maximumf %4, %5 : vector<1x512xf32>
    %cst_7 = arith.constant 0.000000e+00 : f32
    %7 = vector.broadcast %cst_7 : f32 to vector<1x512xf32>
    %8 = arith.subf %7, %0 : vector<1x512xf32>
    %9 = math.log1p %8 : vector<1x512xf32>
    %cst_8 = arith.constant -1.000000e+02 : f32
    %10 = vector.broadcast %cst_8 : f32 to vector<1x512xf32>
    %11 = arith.maximumf %9, %10 : vector<1x512xf32>
    %12 = arith.mulf %1, %6 : vector<1x512xf32>
    %cst_9 = arith.constant 1.000000e+00 : f32
    %13 = vector.broadcast %cst_9 : f32 to vector<1x512xf32>
    %14 = arith.subf %13, %1 : vector<1x512xf32>
    %15 = arith.mulf %14, %11 : vector<1x512xf32>
    %16 = arith.addf %12, %15 : vector<1x512xf32>
    %cst_10 = arith.constant 0.000000e+00 : f32
    %17 = vector.broadcast %cst_10 : f32 to vector<1x512xf32>
    %18 = arith.subf %17, %16 : vector<1x512xf32>
    %19 = arith.mulf %18, %2 : vector<1x512xf32>
    %20 = arith.mulf %19, %3 : vector<1x512xf32>
    %c0_11 = arith.constant 0 : index
    %c0_12 = arith.constant 0 : index
    %21 = vector.load %arg5[%c0_11, %c0_12] : memref<1x512xf32, #tpu.memory_space<vmem>>, vector<1x512xf32>
    tpu.vector_store %arg5[%c0_11, %c0_12], %20 {strides = array<i32>} : memref<1x512xf32, #tpu.memory_space<vmem>>, vector<1x512xf32>,
    return
  }
  func.func @transform_0(%arg0: i32) -> (i32, i32) {
    %c0_i32 = arith.constant 0 : i32
    %c0_i32_0 = arith.constant 0 : i32
    return %arg0, %c0_i32 : i32, i32
  }
  func.func @transform_1(%arg0: i32) -> (i32, i32) {
    %c0_i32 = arith.constant 0 : i32
    %c0_i32_0 = arith.constant 0 : i32
    return %arg0, %c0_i32 : i32, i32
  }
  func.func @transform_2(%arg0: i32) -> (i32, i32) {
    %c0_i32 = arith.constant 0 : i32
    %c0_i32_0 = arith.constant 0 : i32
    return %arg0, %c0_i32 : i32, i32
  }
  func.func @transform_3(%arg0: i32) -> (i32, i32) {
    %c0_i32 = arith.constant 0 : i32
    %c0_i32_0 = arith.constant 0 : i32
    return %arg0, %c0_i32 : i32, i32
  }
  func.func @transform_4(%arg0: i32) -> (i32, i32) {
    %c0_i32 = arith.constant 0 : i32
    %c0_i32_0 = arith.constant 0 : i32
    return %arg0, %c0_i32 : i32, i32
  }
}

</mosaic_0001>

<bundles_post_ra>
// kernel: tpu_custom_call.1
= control target key start
LH: loop header
LB: loop body
LE: loop exit
PB: predicated region body
PF: predicated region fallthrough
CT: control target
= control target key end

     0   :  { %9 = vsyncpa [#allocation3], 0  ;;  %s237_s0 = inlined_call_operand.hbm [shape: f32[1,512], index: 0, kind: input, shape index: {}]   ;;  %s238_s1 = inlined_call_operand.hbm [shape: f32[1,512], index: 1, kind: input, shape index: {}]   ;;  %s239_s2 = inlined_call_operand.hbm [shape: f32[1,512], index: 2, kind: input, shape index: {}]   ;;  %s240_s3 = inlined_call_operand.vmem [shape: f32[1,512], index: 3, kind: input, shape index: {}]   ;;  %s241_s4 = inlined_call_operand.hbm [shape: f32[1,512], index: 4, kind: output, shape index: {}]  }
   0x1   :  { %10 = vsyncpa [#allocation6], 0 }
   0x2   :  { %11 = vsyncpa [#allocation4], 0  ;;  %s193_s15 = smov [#allocation5]   ;;  %s194_s17 = smov [#allocation2]  }
   0x3   :  { %s28_s16 = sshll.u32 %s193_s15, 4  ;;  %s18_s18 = sshll.u32 %s194_s17, 4  ;;  %s29_s16 = int_to_ptr.vmem [resolvable:$true] %s28_s16  ;;  %s19_s18 = int_to_ptr.vmem [resolvable:$true] %s18_s18 }
   0x4   :  { %s115_s19 = scalar_lea.vmem %s29_s16, 64  ;;  %p120_p1 = scmp.lt.s32.totalorder %s29_s16, %s29_s16 }
   0x5   :  { %p116_p0 = scmp.ne.s32.totalorder %s29_s16, %s115_s19  ;;  %p121_p2 = scmp.lt.s32.totalorder %s115_s19, %s115_s19 }
   0x7   :  { %p122_p3 = por %p121_p2, %p120_p1 }
   0x9   :  { %p123_p4 = pnand %p122_p3, %p116_p0 }
   0xb   :  { %126 = shalt.err (!%p123_p4)
}
   0xc   :  { %31 = dma.hbm_to_vmem [thread:$0]  %s238_s1, 64, %s29_s16, [#allocation6]  }
   0xd   :  { %s135_s22 = scalar_lea.vmem %s19_s18, 64  ;;  %p140_p6 = scmp.lt.s32.totalorder %s19_s18, %s19_s18 }
   0xe   :  { %p136_p5 = scmp.ne.s32.totalorder %s19_s18, %s135_s22  ;;  %p141_p7 = scmp.lt.s32.totalorder %s135_s22, %s135_s22 }
  0x10   :  { %p142_p8 = por %p141_p7, %p140_p6 }
  0x12   :  { %p143_p9 = pnand %p142_p8, %p136_p5 }
  0x14   :  { %146 = shalt.err (!%p143_p9)
}
  0x15   :  { %21 = dma.hbm_to_vmem [thread:$0]  %s237_s0, 64, %s19_s18, [#allocation3]  }
  0x16   :  { %s195_s25 = smov [#allocation7]  }
  0x17   :  { %s38_s26 = sshll.u32 %s195_s25, 4  ;;  %s39_s26 = int_to_ptr.vmem [resolvable:$true] %s38_s26 }
  0x18   :  { %s155_s27 = scalar_lea.vmem %s39_s26, 64  ;;  %p160_p11 = scmp.lt.s32.totalorder %s39_s26, %s39_s26 }
  0x19   :  { %p156_p10 = scmp.ne.s32.totalorder %s39_s26, %s155_s27  ;;  %p161_p12 = scmp.lt.s32.totalorder %s155_s27, %s155_s27 }
  0x1b   :  { %p162_p13 = por %p161_p12, %p160_p11 }
  0x1d   :  { %p163_p0 = pnand %p162_p13, %p156_p10 }
  0x1f   :  { %166 = shalt.err (!%p163_p0)
}
  0x20   :  { %41 = dma.hbm_to_vmem [thread:$0]  %s239_s2, 64, %s39_s26, [#allocation6]  }
  0x21   :  { %187 = dma.done.wait [#allocation3], 64  }
  0x22   :  { %188 = vsyncadd [#allocation3], 4294967232 }
  0x23   :  { %189 = dma.done.wait [#allocation6], 128  }
  0x24   :  { %190 = vsyncadd [#allocation6], 4294967168  ;;  %v53_v0 = vld [vmem:[#allocation2] sm:$0xf]  ;;  %v54_v8 = vld [vmem:[#allocation5] sm:$0xf]  ;;  %v78_v20 = vlaneseq }
  0x25   :  { %103 = vlog2.f32 %v53_v0  ;;  %v60_v1 = vsub.f32 0.0, %v53_v0  ;;  %v72_v13 = vsub.f32 1.0, %v54_v8  ;;  %v55_v19 = vld [vmem:[#allocation7] sm:$0xf]  ;;  %v56_v22 = vld [vmem:[%s240_s3] sm:$0xf] }
  0x26   :  { %s196_s29 = smov [#allocation8]   ;;  %vm80_vm1 = vcmp.lt.s32.totalorder %v78_v20, 512 }
  0x27   :  { %v61_v2 = vadd.f32 1.0, %v60_v1  ;;  %v64_v3 = vmul.f32 -0.5, %v60_v1  ;;  %v67_v6 = vand.u32 2147483647, %v60_v1  ;;  %s89_s30 = sshll.u32 %s196_s29, 4  ;;  %s90_s30 = int_to_ptr.vmem [resolvable:$true] %s89_s30 }
  0x28   :  { %s167_s5 = scalar_lea.vmem %s90_s30, 64  ;;  %p172_p2 = scmp.lt.s32.totalorder %s90_s30, %s90_s30 }
  0x29   :  { %105 = vlog2.f32 %v61_v2  ;;  %v65_v4 = vadd.f32 1.0, %v64_v3  ;;  %vm68_vm0 = vcmp.lt.f32.partialorder %v67_v6, 0.0004427343  ;;  %p168_p1 = scmp.ne.s32.totalorder %s90_s30, %s167_s5  ;;  %p173_p3 = scmp.lt.s32.totalorder %s167_s5, %s167_s5 }
  0x2b   :  { %v66_v9 = vmul.f32 %v65_v4, %v60_v1  ;;  %p174_p4 = por %p173_p3, %p172_p2 }
  0x2d   :  { %p175_p5 = pnand %p174_p4, %p168_p1 }
  0x32   :  { %v104_v5 = vpop.eup %103 }
  0x33   :  { %v58_v7 = vmul.f32 0.6931472, %v104_v5 }
  0x35   :  { %v59_v11 = vmax.f32 %v58_v7, -100.0 }
  0x36   :  { %v106_v10 = vpop.eup %105 }
  0x37   :  { %v63_v12 = vmul.f32 0.6931472, %v106_v10  ;;  %v71_v16 = vmul.f32 %v59_v11, %v54_v8 }
  0x39   :  { %v69_v14 = vsel %vm68_vm0, %v66_v9, %v63_v12 }
  0x3a   :  { %v70_v15 = vmax.f32 %v69_v14, -100.0 }
  0x3c   :  { %v73_v17 = vmul.f32 %v72_v13, %v70_v15 }
  0x3e   :  { %v74_v18 = vadd.f32 %v73_v17, %v71_v16 }
  0x40   :  { %v75_v21 = vsub.f32 0.0, %v74_v18 }
  0x42   :  { %v76_v23 = vmul.f32 %v75_v21, %v55_v19 }
  0x44   :  { %v77_v24 = vmul.f32 %v76_v23, %v56_v22 }
  0x46   :  { %82 = vst.msk [vmem:[#allocation8] sm:$0xf] %vm80_vm1, %v77_v24 }
  0x47   :  { %178 = shalt.err (!%p175_p5)
}
  0x48   :  { %92 = dma.vmem_to_hbm [thread:$0]  %s90_s30, 64, %s241_s4, [#allocation4]  }
  0x49   :  { %191 = dma.done.wait [#allocation4], 64  }
  0x4a   :  { %192 = vsyncadd [#allocation4], 4294967232 }
  0x4b   :  { %96 = vsyncpa [#allocation3], 1 }
  0x4c   :  { %97 = vsyncpa [#allocation6], 1 }
  0x4d   :  { %98 = vsyncpa [#allocation4], 1 }

</bundles_post_ra>
